<compile_context>
chip_gen: v6e
topology: v6e:2x2x1
jax: 0.10.0
libtpu: 0.0.40
codegen_flags: <defaults>
</compile_context>

<pallas_src>
import functools
import math

import jax
import jax.numpy as jnp
from jax.experimental import pallas as pl
from jax.experimental.pallas import tpu as pltpu


# ---------------------------------------------------------------------------
# Pass 1: per-row partial sum / sum-of-squares, accumulated directly into the
# resident output blocks (one partial per "parallel" batch shard).
# ---------------------------------------------------------------------------
def _stats_kernel(x_ref, psum_ref, psq_ref, *, n_chunks, acc_w, tile_l, lane_valid):
    n = pl.program_id(1)
    t = pl.program_id(2)

    @pl.when((n == 0) & (t == 0))
    def _():
        psum_ref[...] = jnp.zeros_like(psum_ref)
        psq_ref[...] = jnp.zeros_like(psq_ref)

    x = x_ref[...].astype(jnp.float32)                  # (1, ROWS, tile_l)
    if lane_valid is not None:
        # Ragged last lane tile: zero out lanes beyond the true extent.
        lane = jax.lax.broadcasted_iota(jnp.int32, x.shape, 2) + t * tile_l
        x = jnp.where(lane < lane_valid, x, 0.0)

    # Accumulate acc_w-wide partials with VPU adds only; the single cross-lane
    # reduction happens once, in the tiny host-side epilogue.
    acc_s = psum_ref[...]
    acc_q = psq_ref[...]
    for j in range(n_chunks):                           # static unroll
        c = x[:, :, j * acc_w:(j + 1) * acc_w]
        acc_s = acc_s + c
        acc_q = acc_q + c * c
    psum_ref[...] = acc_s
    psq_ref[...] = acc_q


# ---------------------------------------------------------------------------
# Pass 2: pure per-tile FMA with precomputed per-row scale / shift.
# ---------------------------------------------------------------------------
def _norm_kernel(x_ref, scale_ref, shift_ref, o_ref):
    x = x_ref[...].astype(jnp.float32)                  # (1, ROWS, tile_l)
    o_ref[...] = (x * scale_ref[...] + shift_ref[...]).astype(o_ref.dtype)


def new_batch_norm2d(x, old_weight, old_bias, eps=1e-5):
    """x: (N, C, H, W).  old_weight / old_bias: (C,)."""
    N, C, H, W = x.shape
    HW = H * W
    count = N * HW

    # ---- sublane folding: view each channel as S rows of HW/S lanes (zero-copy
    # reshape, since C and H*W are adjacent in NCHW memory).
    S = 8 // math.gcd(C, 8)
    if S > 1 and HW % S != 0:
        S = 1
    ROWS = C * S
    LL = HW // S

    xr = x.reshape(N, ROWS, LL)                         # zero-copy NCHW view

    # ---- lane-tile selection (multiple of 128, capped by a ~2 MiB block budget
    # so double-buffered pipelines fit every generation's scoped VMEM).
    TARGET_BLOCK_BYTES = 2 * 1024 * 1024
    MAX_TL = 8192
    budget_tl = max(128, ((TARGET_BLOCK_BYTES // (ROWS * 4)) // 128) * 128)
    cap = min(MAX_TL, budget_tl)
    if LL % 128 == 0:
        tl = min(LL, cap)
    elif LL >= 128:
        tl = min((LL // 128) * 128, cap)
    else:
        tl = LL                                          # tiny spatial: full extent
    T = pl.cdiv(LL, tl)
    lane_valid = LL if (T * tl != LL) else None          # mask only when ragged

    if tl % 128 == 0:
        acc_w, n_chunks = 128, tl // 128
    else:
        acc_w, n_chunks = tl, 1

    # ---- split the batch across 2 TensorCores where possible (v7x megacore);
    # harmless on single-TC chips.
    P = 2 if (N % 2 == 0 and N >= 2) else 1
    NP = N // P

    vmem_limit = 32 * 1024 * 1024                        # safe on v5e / v6e / v7x

    psum, psq = pl.pallas_call(
        functools.partial(_stats_kernel, n_chunks=n_chunks, acc_w=acc_w,
                          tile_l=tl, lane_valid=lane_valid),
        out_shape=(
            jax.ShapeDtypeStruct((P, ROWS, acc_w), jnp.float32),
            jax.ShapeDtypeStruct((P, ROWS, acc_w), jnp.float32),
        ),
        grid=(P, NP, T),
        in_specs=[pl.BlockSpec((1, ROWS, tl), lambda p, n, t: (p * NP + n, 0, t))],
        out_specs=(
            pl.BlockSpec((1, ROWS, acc_w), lambda p, n, t: (p, 0, 0)),
            pl.BlockSpec((1, ROWS, acc_w), lambda p, n, t: (p, 0, 0)),
        ),
        compiler_params=pltpu.CompilerParams(
            dimension_semantics=("parallel", "arbitrary", "arbitrary"),
            vmem_limit_bytes=vmem_limit,
        ),
    )(xr)

    # ---- tiny epilogue (C-sized): combine partials, fold S rows per channel,
    # clamp the variance, and precompute per-row scale / shift.
    s = psum.reshape(P, C, S, acc_w).sum(axis=(0, 2, 3))
    q = psq.reshape(P, C, S, acc_w).sum(axis=(0, 2, 3))
    inv_cnt = 1.0 / float(count)
    mean = s * inv_cnt
    var = jnp.maximum(q * inv_cnt - mean * mean, 0.0)    # guard cancellation
    scale_c = old_weight.astype(jnp.float32) * jax.lax.rsqrt(var + eps)
    shift_c = old_bias.astype(jnp.float32) - mean * scale_c
    scale = jnp.repeat(scale_c, S).reshape(ROWS, 1)
    shift = jnp.repeat(shift_c, S).reshape(ROWS, 1)

    y = pl.pallas_call(
        _norm_kernel,
        out_shape=jax.ShapeDtypeStruct((N, ROWS, LL), x.dtype),
        grid=(N, T),
        in_specs=[
            pl.BlockSpec((1, ROWS, tl), lambda n, t: (n, 0, t)),
            pl.BlockSpec((ROWS, 1), lambda n, t: (0, 0)),
            pl.BlockSpec((ROWS, 1), lambda n, t: (0, 0)),
        ],
        out_specs=pl.BlockSpec((1, ROWS, tl), lambda n, t: (n, 0, t)),
        compiler_params=pltpu.CompilerParams(
            dimension_semantics=("parallel", "parallel"),
            vmem_limit_bytes=vmem_limit,
        ),
    )(xr, scale, shift)

    return y.reshape(N, C, H, W)                         # zero-copy back to NCHW


def _reference(x, gamma, beta, eps=1e-5):
    mean = x.mean(axis=(0, 2, 3))
    var = x.var(axis=(0, 2, 3))                          # biased (unbiased=False)
    m = mean.reshape(1, -1, 1, 1)
    v = var.reshape(1, -1, 1, 1)
    g = gamma.reshape(1, -1, 1, 1)
    b = beta.reshape(1, -1, 1, 1)
    return (x - m) / jnp.sqrt(v + eps) * g + b


if __name__ == "__main__":
    key = jax.random.PRNGKey(0)
    kx, kw, kb = jax.random.split(key, 3)

    N, C, H, W = 2, 4, 16, 16
    eps = 1e-5

    x = jax.random.normal(kx, (N, C, H, W), dtype=jnp.float32) * 2.0 + 0.5
    old_weight = jax.random.normal(kw, (C,), dtype=jnp.float32) * 0.1 + 1.0
    old_bias = jax.random.normal(kb, (C,), dtype=jnp.float32) * 0.1

    fn = jax.jit(functools.partial(new_batch_norm2d, eps=eps))
    out = fn(x, old_weight, old_bias)
    out = jax.block_until_ready(out)

    ref = _reference(x, old_weight, old_bias, eps=eps)
    assert out.shape == (N, C, H, W)
    assert jnp.allclose(out, ref, atol=1e-4, rtol=1e-4), "mismatch vs reference"

    print("KERNEL_OK")
</pallas_src>

<mosaic_0001>
module attributes {stable_mosaic.version = 11 : i64} {
  func.func @_stats_kernel(%arg0: i32, %arg1: i32, %arg2: i32, %arg3: memref<1x8x128xf32, #tpu.memory_space<vmem>>, %arg4: memref<1x8x128xf32, #tpu.memory_space<vmem>>, %arg5: memref<1x8x128xf32, #tpu.memory_space<vmem>>) attributes {dimension_semantics = [#tpu.dimension_semantics<parallel>, #tpu.dimension_semantics<arbitrary>, #tpu.dimension_semantics<arbitrary>], iteration_bounds = array<i64: 2, 1, 1>, scalar_prefetch = 0 : i64, scratch_operands = 0 : i64, tpu.core_type = #tpu.core_type<tc>, window_params = [{transform_indices = @transform_0, window_bounds = array<i64: 1, 8, 128>}, {transform_indices = @transform_1, window_bounds = array<i64: 1, 8, 128>}, {transform_indices = @transform_2, window_bounds = array<i64: 1, 8, 128>}]} {
    %c0_i32 = arith.constant 0 : i32
    %0 = arith.cmpi eq, %arg1, %c0_i32 : i32
    %c0_i32_0 = arith.constant 0 : i32
    %1 = arith.cmpi eq, %arg2, %c0_i32_0 : i32
    %2 = arith.andi %0, %1 : i1
    %3 = arith.extui %2 : i1 to i32
    %c0_i32_1 = arith.constant 0 : i32
    %4 = arith.cmpi ne, %3, %c0_i32_1 : i32
    scf.if %4 {
      %cst = arith.constant 0.000000e+00 : f32
      %13 = vector.broadcast %cst : f32 to vector<1x8x128xf32>
      %c0_16 = arith.constant 0 : index
      %c0_17 = arith.constant 0 : index
      %c0_18 = arith.constant 0 : index
      %14 = vector.load %arg4[%c0_16, %c0_17, %c0_18] : memref<1x8x128xf32, #tpu.memory_space<vmem>>, vector<1x8x128xf32>
      tpu.vector_store %arg4[%c0_16, %c0_17, %c0_18], %13 {strides = array<i32>} : memref<1x8x128xf32, #tpu.memory_space<vmem>>, vector<1x8x128xf32>,
      %cst_19 = arith.constant 0.000000e+00 : f32
      %15 = vector.broadcast %cst_19 : f32 to vector<1x8x128xf32>
      %c0_20 = arith.constant 0 : index
      %c0_21 = arith.constant 0 : index
      %c0_22 = arith.constant 0 : index
      %16 = vector.load %arg5[%c0_20, %c0_21, %c0_22] : memref<1x8x128xf32, #tpu.memory_space<vmem>>, vector<1x8x128xf32>
      tpu.vector_store %arg5[%c0_20, %c0_21, %c0_22], %15 {strides = array<i32>} : memref<1x8x128xf32, #tpu.memory_space<vmem>>, vector<1x8x128xf32>,
    } else {
    }
    %c0 = arith.constant 0 : index
    %c0_2 = arith.constant 0 : index
    %c0_3 = arith.constant 0 : index
    %5 = vector.load %arg3[%c0, %c0_2, %c0_3] : memref<1x8x128xf32, #tpu.memory_space<vmem>>, vector<1x8x128xf32>
    %c0_4 = arith.constant 0 : index
    %c0_5 = arith.constant 0 : index
    %c0_6 = arith.constant 0 : index
    %6 = vector.load %arg4[%c0_4, %c0_5, %c0_6] : memref<1x8x128xf32, #tpu.memory_space<vmem>>, vector<1x8x128xf32>
    %c0_7 = arith.constant 0 : index
    %c0_8 = arith.constant 0 : index
    %c0_9 = arith.constant 0 : index
    %7 = vector.load %arg5[%c0_7, %c0_8, %c0_9] : memref<1x8x128xf32, #tpu.memory_space<vmem>>, vector<1x8x128xf32>
    %8 = arith.addf %6, %5 : vector<1x8x128xf32>
    %9 = arith.mulf %5, %5 : vector<1x8x128xf32>
    %10 = arith.addf %7, %9 : vector<1x8x128xf32>
    %c0_10 = arith.constant 0 : index
    %c0_11 = arith.constant 0 : index
    %c0_12 = arith.constant 0 : index
    %11 = vector.load %arg4[%c0_10, %c0_11, %c0_12] : memref<1x8x128xf32, #tpu.memory_space<vmem>>, vector<1x8x128xf32>
    tpu.vector_store %arg4[%c0_10, %c0_11, %c0_12], %8 {strides = array<i32>} : memref<1x8x128xf32, #tpu.memory_space<vmem>>, vector<1x8x128xf32>,
    %c0_13 = arith.constant 0 : index
    %c0_14 = arith.constant 0 : index
    %c0_15 = arith.constant 0 : index
    %12 = vector.load %arg5[%c0_13, %c0_14, %c0_15] : memref<1x8x128xf32, #tpu.memory_space<vmem>>, vector<1x8x128xf32>
    tpu.vector_store %arg5[%c0_13, %c0_14, %c0_15], %10 {strides = array<i32>} : memref<1x8x128xf32, #tpu.memory_space<vmem>>, vector<1x8x128xf32>,
    return
  }
  func.func @transform_0(%arg0: i32, %arg1: i32, %arg2: i32) -> (i32, i32, i32) {
    %c1_i32 = arith.constant 1 : i32
    %0 = arith.muli %arg0, %c1_i32 : i32
    %1 = arith.addi %0, %arg1 : i32
    %c0_i32 = arith.constant 0 : i32
    %c0_i32_0 = arith.constant 0 : i32
    return %1, %c0_i32, %arg2 : i32, i32, i32
  }
  func.func @transform_1(%arg0: i32, %arg1: i32, %arg2: i32) -> (i32, i32, i32) {
    %c0_i32 = arith.constant 0 : i32
    %c0_i32_0 = arith.constant 0 : i32
    %c0_i32_1 = arith.constant 0 : i32
    return %arg0, %c0_i32, %c0_i32_0 : i32, i32, i32
  }
  func.func @transform_2(%arg0: i32, %arg1: i32, %arg2: i32) -> (i32, i32, i32) {
    %c0_i32 = arith.constant 0 : i32
    %c0_i32_0 = arith.constant 0 : i32
    %c0_i32_1 = arith.constant 0 : i32
    return %arg0, %c0_i32, %c0_i32_0 : i32, i32, i32
  }
}

module attributes {stable_mosaic.version = 11 : i64} {
  func.func @_norm_kernel(%arg0: i32, %arg1: i32, %arg2: memref<1x8x128xf32, #tpu.memory_space<vmem>>, %arg3: memref<8x1xf32, #tpu.memory_space<vmem>>, %arg4: memref<8x1xf32, #tpu.memory_space<vmem>>, %arg5: memref<1x8x128xf32, #tpu.memory_space<vmem>>) attributes {dimension_semantics = [#tpu.dimension_semantics<parallel>, #tpu.dimension_semantics<parallel>], iteration_bounds = array<i64: 2, 1>, scalar_prefetch = 0 : i64, scratch_operands = 0 : i64, tpu.core_type = #tpu.core_type<tc>, window_params = [{transform_indices = @transform_0, window_bounds = array<i64: 1, 8, 128>}, {pipeline_mode = #tpu.pipeline_mode<synchronous>, transform_indices = @transform_1, window_bounds = array<i64: 8, 1>}, {pipeline_mode = #tpu.pipeline_mode<synchronous>, transform_indices = @transform_2, window_bounds = array<i64: 8, 1>}, {transform_indices = @transform_3, window_bounds = array<i64: 1, 8, 128>}]} {
    %c0 = arith.constant 0 : index
    %c0_0 = arith.constant 0 : index
    %c0_1 = arith.constant 0 : index
    %0 = vector.load %arg2[%c0, %c0_0, %c0_1] : memref<1x8x128xf32, #tpu.memory_space<vmem>>, vector<1x8x128xf32>
    %c0_2 = arith.constant 0 : index
    %c0_3 = arith.constant 0 : index
    %1 = vector.load %arg3[%c0_2, %c0_3] : memref<8x1xf32, #tpu.memory_space<vmem>>, vector<8x1xf32>
    %2 = vector.shape_cast %1 : vector<8x1xf32> to vector<1x8x1xf32>
    %3 = vector.broadcast %2 : vector<1x8x1xf32> to vector<1x8x128xf32>
    %4 = arith.mulf %0, %3 : vector<1x8x128xf32>
    %c0_4 = arith.constant 0 : index
    %c0_5 = arith.constant 0 : index
    %5 = vector.load %arg4[%c0_4, %c0_5] : memref<8x1xf32, #tpu.memory_space<vmem>>, vector<8x1xf32>
    %6 = vector.shape_cast %5 : vector<8x1xf32> to vector<1x8x1xf32>
    %7 = vector.broadcast %6 : vector<1x8x1xf32> to vector<1x8x128xf32>
    %8 = arith.addf %4, %7 : vector<1x8x128xf32>
    %c0_6 = arith.constant 0 : index
    %c0_7 = arith.constant 0 : index
    %c0_8 = arith.constant 0 : index
    %9 = vector.load %arg5[%c0_6, %c0_7, %c0_8] : memref<1x8x128xf32, #tpu.memory_space<vmem>>, vector<1x8x128xf32>
    tpu.vector_store %arg5[%c0_6, %c0_7, %c0_8], %8 {strides = array<i32>} : memref<1x8x128xf32, #tpu.memory_space<vmem>>, vector<1x8x128xf32>,
    return
  }
  func.func @transform_0(%arg0: i32, %arg1: i32) -> (i32, i32, i32) {
    %c0_i32 = arith.constant 0 : i32
    %c0_i32_0 = arith.constant 0 : i32
    return %arg0, %c0_i32, %arg1 : i32, i32, i32
  }
  func.func @transform_1(%arg0: i32, %arg1: i32) -> (i32, i32) {
    %c0_i32 = arith.constant 0 : i32
    %c0_i32_0 = arith.constant 0 : i32
    %c0_i32_1 = arith.constant 0 : i32
    return %c0_i32, %c0_i32_0 : i32, i32
  }
  func.func @transform_2(%arg0: i32, %arg1: i32) -> (i32, i32) {
    %c0_i32 = arith.constant 0 : i32
    %c0_i32_0 = arith.constant 0 : i32
    %c0_i32_1 = arith.constant 0 : i32
    return %c0_i32, %c0_i32_0 : i32, i32
  }
  func.func @transform_3(%arg0: i32, %arg1: i32) -> (i32, i32, i32) {
    %c0_i32 = arith.constant 0 : i32
    %c0_i32_0 = arith.constant 0 : i32
    return %arg0, %c0_i32, %arg1 : i32, i32, i32
  }
}

</mosaic_0001>

<bundles_post_ra>
// kernel: new_batch_norm2d.2
= control target key start
LH: loop header
LB: loop body
LE: loop exit
PB: predicated region body
PF: predicated region fallthrough
CT: control target
= control target key end

     0   :  { %s375_s9 = smov 0   ;;  %s377_s10 = smov 0   ;;  %s394_s0 = inlined_call_operand.vmem [shape: f32[2,8,128], index: 0, kind: input, shape index: {}]   ;;  %s395_s1 = inlined_call_operand.vmem [shape: f32[2,8,128], index: 1, kind: output, shape index: {0}]   ;;  %s396_s2 = inlined_call_operand.vmem [shape: f32[2,8,128], index: 2, kind: output, shape index: {1}]  }
   0x1   :  { %s356_s11 = smov 0  }
   0x2 LB: > { %s32_s12 = sadd.s32 1, %s354_s10  ;;  %p305_p0 = scmp.ge.s32.totalorder %s358_s11, 1  ;;  %s358_s11 = sphi %s356_s11, %s13_s11   ;;  %s354_s10 = sphi %s377_s10, %s398_s10   ;;  %s350_s9 = sphi %s375_s9, %s397_s9  }
   0x3   : > { %p34_p1 = scmp.ge.s32.totalorder %s32_s12, 2  ;;  %p142_p2 = scmp.lt.s32.totalorder %s358_s11, 3 }
   0x5   : > { %s400_s12 = smov (%p34_p1, %s32_s12), 0  ;;  %p143_p3 = pnand %p305_p0, %p142_p2 }
   0x6   : > { %p171_p4 = scmp.lt.s32.totalorder (!%p143_p3), %s350_s9, 1 }
   0x7   : > { %146 = sbr.rel (%p143_p3) target bundleno = 19 (0x13), region = 24 }
   0xc   : > { %s402_s9 = smov (!%p171_p4, %s350_s9), 1 }
   0xd   : > { %s306_s13 = sshll.u32 %s402_s9, 3 }
   0xe   : > { %s177_s16 = scalar_lea.vmem %s394_s0, %s306_s13  ;;  %s182_s19 = scalar_lea.vmem %s395_s1, %s306_s13 }
   0xf   : > { %v195_v0 = vld [vmem:[%s177_s16] sm:$0xff]  ;;  %s186_s22 = scalar_lea.vmem %s396_s2, %s306_s13 }
  0x10   : > { %v199_v1 = vmul.f32 %v195_v0, %v195_v0  ;;  %201 = vst [vmem:[%s182_s19] sm:$0xff] %v195_v0 }
  0x12   : > { %202 = vst [vmem:[%s186_s22] sm:$0xff] %v199_v1 }
  0x13 PF: > { %s13_s11 = sadd.s32 1, %s358_s11   ;;  %s397_s9 = smov %s354_s10 }
  0x14   : > { %p10_p5 = scmp.ge.s32.totalorder %s13_s11, 4   ;;  %s398_s10 = smov %s400_s12 }
  0x16   :  { %12 = sbr.rel (!%p10_p5) target bundleno = 2 (0x2), region = 70 }

// kernel: new_batch_norm2d.3
= control target key start
LH: loop header
LB: loop body
LE: loop exit
PB: predicated region body
PF: predicated region fallthrough
CT: control target
= control target key end

     0   :  { %s367_s12 = smov 0   ;;  %s369_s13 = smov 0   ;;  %s399_s0 = inlined_call_operand.vmem [shape: f32[2,8,128], index: 0, kind: input, shape index: {}]   ;;  %s400_s1 = inlined_call_operand.vmem [shape: f32[8,1], index: 1, kind: input, shape index: {}]   ;;  %s401_s2 = inlined_call_operand.vmem [shape: f32[8,1], index: 2, kind: input, shape index: {}]   ;;  %s402_s3 = inlined_call_operand.vmem [shape: f32[2,8,128], index: 3, kind: output, shape index: {}]  }
   0x1   :  { %s371_s14 = smov 0  }
   0x2 LB: > { %s25_s15 = sadd.s32 1, %s340_s13  ;;  %p291_p0 = scmp.ge.s32.totalorder %s344_s14, 1  ;;  %s344_s14 = sphi %s371_s14, %s13_s14   ;;  %s340_s13 = sphi %s369_s13, %s404_s13   ;;  %s336_s12 = sphi %s367_s12, %s403_s12  }
   0x3   : > { %p27_p1 = scmp.ge.s32.totalorder %s25_s15, 2  ;;  %p155_p2 = scmp.lt.s32.totalorder %s344_s14, 3 }
   0x5   : > { %s406_s15 = smov (%p27_p1, %s25_s15), 0  ;;  %p156_p3 = pnand %p291_p0, %p155_p2 }
   0x6   : > { %p183_p4 = scmp.lt.s32.totalorder (!%p156_p3), %s336_s12, 1 }
   0x7   : > { %159 = sbr.rel (%p156_p3) target bundleno = 145 (0x91), region = 32 }
   0xc   : > { %v198_v0 = vld [vmem:[%s400_s1] sm:$0xff]  ;;  %v346_v1 = vmov 0   ;;  %s408_s12 = smov (!%p183_p4, %s336_s12), 1 }
   0xd   : > { %321 = vset.pattern.permute.xlu0 %v346_v1  ;;  %v205_v2 = vld [vmem:[%s401_s2] sm:$0xff]  ;;  %s292_s20 = sshll.u32 %s408_s12, 3 }
   0xe   : > { %201 = vperm.xlu0 %321, %v198_v0   ;;  %s189_s23 = scalar_lea.vmem %s399_s0, %s292_s20  ;;  %s196_s26 = scalar_lea.vmem %s402_s3, %s292_s20 }
   0xf   : > { %v197_v4 = vld [vmem:[%s189_s23] sm:$0xff] }
  0x12   : > { %208 = vperm.xlu0 %321, %v205_v2  }
  0x89   : > { %v202_v3 = vpop.permute.xlu0 %201 }
  0x8a   : > { %v204_v5 = vmul.f32 %v202_v3, %v197_v4 }
  0x8d   : > { %v209_v6 = vpop.permute.xlu0 %208 }
  0x8e   : > { %v211_v7 = vadd.f32 %v209_v6, %v204_v5 }
  0x90   : > { %212 = vst [vmem:[%s196_s26] sm:$0xff] %v211_v7 }
  0x91 PF: > { %s13_s14 = sadd.s32 1, %s344_s14   ;;  %s403_s12 = smov %s340_s13 }
  0x92   : > { %p10_p5 = scmp.ge.s32.totalorder %s13_s14, 4   ;;  %s404_s13 = smov %s406_s15 }
  0x94   :  { %12 = sbr.rel (!%p10_p5) target bundleno = 2 (0x2), region = 62 }

</bundles_post_ra>
